<compile_context>
chip_gen: v7x
topology: tpu7x:2x2x1
jax: 0.10.0
libtpu: 0.0.40
codegen_flags: <defaults>
</compile_context>

<pallas_src>
import functools
import math

import jax
import jax.numpy as jnp
from jax.experimental import pallas as pl
from jax.experimental.pallas import tpu as pltpu


def _vmem_gather_kernel(ids_ref, table_ref, w_ref, out_ref, rows_ref,
                        *, token_block, unroll):
    """Fast path: embedding table resident in VMEM; gather = dynamic row reads."""
    tb = token_block
    base = pl.program_id(0) * tb

    @pl.loop(0, tb // unroll)
    def _(jj):
        j0 = jj * unroll
        for u in range(unroll):                      # static unroll: `unroll` rows/iter
            j = j0 + u
            tok = ids_ref[base + j]                  # SMEM scalar read
            rows_ref[pl.ds(j, 1), :] = table_ref[pl.ds(tok, 1), :]

    # out_proj: (TB, E) x (E, O_pad) on the MXU, f32 accumulation.
    out_ref[...] = jnp.dot(
        rows_ref[...], w_ref[...], preferred_element_type=jnp.float32
    ).astype(out_ref.dtype)


def _dma_gather_kernel(ids_ref, table_ref, w_ref, out_ref, rows_ref, sem,
                       *, token_block, unroll):
    """Fallback for large vocabs: table in HBM; per-row DMA gather with batched issue."""
    tb = token_block
    base = pl.program_id(0) * tb

    def row_copy(j):
        # The same helper builds both the start and the wait descriptor, so the copy
        # shape / semaphore can never silently desynchronize (the wait only uses the
        # dst shape + semaphore; the extra SMEM read here is a few cycles).
        tok = ids_ref[base + j]
        return pltpu.make_async_copy(
            table_ref.at[pl.ds(tok, 1), :],
            rows_ref.at[pl.ds(j, 1), :],
            sem.at[0],
        )

    # Phase 1: issue ALL row DMAs (unrolled, no interleaved waits) -> queue stays full.
    @pl.loop(0, tb // unroll)
    def _(jj):
        j0 = jj * unroll
        for u in range(unroll):
            row_copy(j0 + u).start()

    # Phase 2: retire them.  Every copy is identically shaped and signals the same
    # semaphore, so tb matching waits guarantee all tb copies landed before the matmul.
    @pl.loop(0, tb // unroll)
    def _(jj):
        j0 = jj * unroll
        for u in range(unroll):
            row_copy(j0 + u).wait()

    out_ref[...] = jnp.dot(
        rows_ref[...], w_ref[...], preferred_element_type=jnp.float32
    ).astype(out_ref.dtype)


def word_embedding_forward(ids, emb_table, proj_w_t, *, token_block=256, unroll=8,
                           vmem_table_budget_bytes=12 * 2**20):
    """ids: (B, S) integer tokens; emb_table: (V, E); proj_w_t: (E, O) (= torch W.T).

    Returns (B, S, O) = emb_table[ids] @ proj_w_t   (out_proj has no bias).
    """
    B, S = ids.shape
    V, E = emb_table.shape
    E2, O = proj_w_t.shape
    assert E2 == E
    N = B * S

    # Keep the "parallel" grid axis at >= 2 steps when possible so both v7x
    # TensorCores get work; v5e/v6e are single-TC and unaffected.
    tb = token_block
    while tb > 128 and N <= tb:
        tb //= 2
    assert tb % 8 == 0 and tb % unroll == 0

    n_pad = pl.cdiv(N, tb) * tb
    # NOTE: clip keeps the gather in-bounds; torch nn.Embedding would error on
    # out-of-range ids instead of remapping them.
    ids_flat = jnp.clip(ids.reshape(N).astype(jnp.int32), 0, V - 1)
    if n_pad != N:
        ids_flat = jnp.pad(ids_flat, (0, n_pad - N))   # pad with token 0
    # TODO(synk): for very large B*S, pass ids as per-block SMEM tiles instead of
    # scalar-prefetching the whole array (1-D SMEM pads to next_pow2(4N) bytes).

    # Lane-dense output: pad O up to a multiple of 128 (unmasked stores), slice after.
    o_pad = pl.cdiv(O, 128) * 128
    w = proj_w_t if o_pad == O else jnp.pad(proj_w_t, ((0, 0), (0, o_pad - O)))

    table_bytes = V * E * emb_table.dtype.itemsize
    use_vmem_table = table_bytes <= vmem_table_budget_bytes

    if use_vmem_table:
        kernel = functools.partial(_vmem_gather_kernel, token_block=tb, unroll=unroll)
        table_spec = pl.BlockSpec((V, E), lambda i, ids_sp: (0, 0))   # table in VMEM
        scratch = [pltpu.VMEM((tb, E), emb_table.dtype)]              # gathered rows
    else:
        kernel = functools.partial(_dma_gather_kernel, token_block=tb, unroll=unroll)
        table_spec = pl.BlockSpec(memory_space=pl.ANY)                # table stays in HBM
        scratch = [pltpu.VMEM((tb, E), emb_table.dtype),              # gathered rows
                   pltpu.SemaphoreType.DMA((1,))]                     # shared row-DMA sem

    out = pl.pallas_call(
        kernel,
        out_shape=jax.ShapeDtypeStruct((n_pad, o_pad), emb_table.dtype),
        grid_spec=pltpu.PrefetchScalarGridSpec(
            num_scalar_prefetch=1,                      # ids -> SMEM
            grid=(n_pad // tb,),
            in_specs=[
                table_spec,
                # TODO(synk): at production sizes add pipeline_mode=pl.Buffered(1) to
                # these grid-invariant blocks and set vmem_limit_bytes explicitly
                # (single-buffering matters on v7x's 64 MiB VMEM); irrelevant here.
                pl.BlockSpec((E, o_pad), lambda i, ids_sp: (0, 0)),   # proj weight
            ],
            out_specs=pl.BlockSpec((tb, o_pad), lambda i, ids_sp: (i, 0)),
            scratch_shapes=scratch,
        ),
        compiler_params=pltpu.CompilerParams(
            dimension_semantics=("parallel",)),         # shardable across v7x's 2 TCs
    )(ids_flat, emb_table, w)

    return out[:N, :O].reshape(B, S, O)


def init_word_embedding_params(key, *, vocab_size, embedding_dim, output_dim,
                               pad_token, initialization_method="normal1"):
    """Deterministic synthetic init mirroring the module's __init__ shapes."""
    k_emb, k_proj = jax.random.split(key)
    if initialization_method == "uniform1":
        w = jax.random.uniform(k_emb, (vocab_size, embedding_dim),
                               minval=-0.1, maxval=0.1)
    elif initialization_method == "normal1":
        w = 0.02 * jax.random.normal(k_emb, (vocab_size, embedding_dim))
    elif initialization_method == "uniform2":
        w = jax.random.uniform(k_emb, (vocab_size, embedding_dim),
                               minval=-math.sqrt(3), maxval=math.sqrt(3))
    else:  # 'normal2'
        w = jax.random.normal(k_emb, (vocab_size, embedding_dim))
    w = w.at[pad_token].set(0.0)  # padding_idx row zeroed (matches torch)

    # out_proj = nn.Linear(E, O, bias=False), xavier-uniform (fan_in) style init.
    bound = math.sqrt(3.0 / embedding_dim)
    proj_w = jax.random.uniform(k_proj, (output_dim, embedding_dim),
                                minval=-bound, maxval=bound)   # torch layout (O, E)
    return w.astype(jnp.float32), proj_w.astype(jnp.float32)


if __name__ == "__main__":
    # Small but representative shapes: 512 tokens -> 2 grid steps of 256 tokens each;
    # O=192 exercises the lane-padding path; E != O so the Linear projection is active.
    B, S = 2, 256
    V, E, O = 1024, 128, 192
    PAD = 0

    key = jax.random.PRNGKey(0)
    k_ids, k_params = jax.random.split(key)

    emb_table, proj_w = init_word_embedding_params(
        k_params, vocab_size=V, embedding_dim=E, output_dim=O,
        pad_token=PAD, initialization_method="normal1")
    proj_w_t = proj_w.T  # (E, O) for the kernel

    ids = jax.random.randint(k_ids, (B, S), 0, V, dtype=jnp.int32)
    ids = ids.at[0, -1].set(PAD)  # include a PAD token

    # Reference in plain JAX: embedding gather + linear projection.
    y_ref = jnp.take(emb_table, ids, axis=0) @ proj_w_t

    # Fast path: 512 KiB table -> VMEM-resident gather.
    y_fast = jax.block_until_ready(word_embedding_forward(ids, emb_table, proj_w_t))
    assert y_fast.shape == (B, S, O)
    assert jnp.allclose(y_fast, y_ref, atol=2e-3, rtol=2e-3), \
        float(jnp.max(jnp.abs(y_fast - y_ref)))

    # Large-vocab fallback: force the HBM per-row DMA gather path.
    y_dma = jax.block_until_ready(
        word_embedding_forward(ids, emb_table, proj_w_t, vmem_table_budget_bytes=0))
    assert jnp.allclose(y_dma, y_ref, atol=2e-3, rtol=2e-3), \
        float(jnp.max(jnp.abs(y_dma - y_ref)))

    print("KERNEL_OK")
</pallas_src>

<mosaic_0001>
module attributes {stable_mosaic.version = 11 : i64} {
  func.func @_vmem_gather_kernel(%arg0: i32, %arg1: memref<512xi32, #tpu.memory_space<smem>>, %arg2: memref<1024x128xf32, #tpu.memory_space<vmem>>, %arg3: memref<128x256xf32, #tpu.memory_space<vmem>>, %arg4: memref<256x256xf32, #tpu.memory_space<vmem>>, %arg5: memref<256x128xf32, #tpu.memory_space<vmem>>) attributes {dimension_semantics = [#tpu.dimension_semantics<parallel>], iteration_bounds = array<i64: 2>, scalar_prefetch = 1 : i64, scratch_operands = 1 : i64, tpu.core_type = #tpu.core_type<tc>, window_params = [{pipeline_mode = #tpu.pipeline_mode<synchronous>, transform_indices = @transform_0, window_bounds = array<i64: 1024, 128>}, {pipeline_mode = #tpu.pipeline_mode<synchronous>, transform_indices = @transform_1, window_bounds = array<i64: 128, 256>}, {transform_indices = @transform_2, window_bounds = array<i64: 256, 256>}]} {
    %c256_i32 = arith.constant 256 : i32
    %0 = arith.muli %arg0, %c256_i32 : i32
    %c0_i32 = arith.constant 0 : i32
    %c32_i32 = arith.constant 32 : i32
    %1 = arith.addi %c0_i32, %c32_i32 : i32
    %c1_i32 = arith.constant 1 : i32
    scf.for %arg6 = %c0_i32 to %1 step %c1_i32  : i32 {
      %c1_i32_6 = arith.constant 1 : i32
      %6 = arith.muli %arg6, %c1_i32_6 : i32
      %c0_i32_7 = arith.constant 0 : i32
      %7 = arith.addi %c0_i32_7, %6 : i32
      %c8_i32 = arith.constant 8 : i32
      %8 = arith.muli %7, %c8_i32 : i32
      %c0_i32_8 = arith.constant 0 : i32
      %9 = arith.addi %8, %c0_i32_8 : i32
      %10 = arith.addi %0, %9 : i32
      %11 = arith.index_cast %10 : i32 to index
      %12 = memref.load %arg1[%11] : memref<512xi32, #tpu.memory_space<smem>>
      %13 = arith.index_cast %12 : i32 to index
      %c0_9 = arith.constant 0 : index
      %14 = vector.load %arg2[%13, %c0_9] : memref<1024x128xf32, #tpu.memory_space<vmem>>, vector<1x128xf32>
      %15 = arith.index_cast %9 : i32 to index
      %c0_10 = arith.constant 0 : index
      %16 = vector.load %arg5[%15, %c0_10] : memref<256x128xf32, #tpu.memory_space<vmem>>, vector<1x128xf32>
      tpu.vector_store %arg5[%15, %c0_10], %14 {strides = array<i32>} : memref<256x128xf32, #tpu.memory_space<vmem>>, vector<1x128xf32>,
      %c1_i32_11 = arith.constant 1 : i32
      %17 = arith.addi %8, %c1_i32_11 : i32
      %18 = arith.addi %0, %17 : i32
      %19 = arith.index_cast %18 : i32 to index
      %20 = memref.load %arg1[%19] : memref<512xi32, #tpu.memory_space<smem>>
      %21 = arith.index_cast %20 : i32 to index
      %c0_12 = arith.constant 0 : index
      %22 = vector.load %arg2[%21, %c0_12] : memref<1024x128xf32, #tpu.memory_space<vmem>>, vector<1x128xf32>
      %23 = arith.index_cast %17 : i32 to index
      %c0_13 = arith.constant 0 : index
      %24 = vector.load %arg5[%23, %c0_13] : memref<256x128xf32, #tpu.memory_space<vmem>>, vector<1x128xf32>
      tpu.vector_store %arg5[%23, %c0_13], %22 {strides = array<i32>} : memref<256x128xf32, #tpu.memory_space<vmem>>, vector<1x128xf32>,
      %c2_i32 = arith.constant 2 : i32
      %25 = arith.addi %8, %c2_i32 : i32
      %26 = arith.addi %0, %25 : i32
      %27 = arith.index_cast %26 : i32 to index
      %28 = memref.load %arg1[%27] : memref<512xi32, #tpu.memory_space<smem>>
      %29 = arith.index_cast %28 : i32 to index
      %c0_14 = arith.constant 0 : index
      %30 = vector.load %arg2[%29, %c0_14] : memref<1024x128xf32, #tpu.memory_space<vmem>>, vector<1x128xf32>
      %31 = arith.index_cast %25 : i32 to index
      %c0_15 = arith.constant 0 : index
      %32 = vector.load %arg5[%31, %c0_15] : memref<256x128xf32, #tpu.memory_space<vmem>>, vector<1x128xf32>
      tpu.vector_store %arg5[%31, %c0_15], %30 {strides = array<i32>} : memref<256x128xf32, #tpu.memory_space<vmem>>, vector<1x128xf32>,
      %c3_i32 = arith.constant 3 : i32
      %33 = arith.addi %8, %c3_i32 : i32
      %34 = arith.addi %0, %33 : i32
      %35 = arith.index_cast %34 : i32 to index
      %36 = memref.load %arg1[%35] : memref<512xi32, #tpu.memory_space<smem>>
      %37 = arith.index_cast %36 : i32 to index
      %c0_16 = arith.constant 0 : index
      %38 = vector.load %arg2[%37, %c0_16] : memref<1024x128xf32, #tpu.memory_space<vmem>>, vector<1x128xf32>
      %39 = arith.index_cast %33 : i32 to index
      %c0_17 = arith.constant 0 : index
      %40 = vector.load %arg5[%39, %c0_17] : memref<256x128xf32, #tpu.memory_space<vmem>>, vector<1x128xf32>
      tpu.vector_store %arg5[%39, %c0_17], %38 {strides = array<i32>} : memref<256x128xf32, #tpu.memory_space<vmem>>, vector<1x128xf32>,
      %c4_i32 = arith.constant 4 : i32
      %41 = arith.addi %8, %c4_i32 : i32
      %42 = arith.addi %0, %41 : i32
      %43 = arith.index_cast %42 : i32 to index
      %44 = memref.load %arg1[%43] : memref<512xi32, #tpu.memory_space<smem>>
      %45 = arith.index_cast %44 : i32 to index
      %c0_18 = arith.constant 0 : index
      %46 = vector.load %arg2[%45, %c0_18] : memref<1024x128xf32, #tpu.memory_space<vmem>>, vector<1x128xf32>
      %47 = arith.index_cast %41 : i32 to index
      %c0_19 = arith.constant 0 : index
      %48 = vector.load %arg5[%47, %c0_19] : memref<256x128xf32, #tpu.memory_space<vmem>>, vector<1x128xf32>
      tpu.vector_store %arg5[%47, %c0_19], %46 {strides = array<i32>} : memref<256x128xf32, #tpu.memory_space<vmem>>, vector<1x128xf32>,
      %c5_i32 = arith.constant 5 : i32
      %49 = arith.addi %8, %c5_i32 : i32
      %50 = arith.addi %0, %49 : i32
      %51 = arith.index_cast %50 : i32 to index
      %52 = memref.load %arg1[%51] : memref<512xi32, #tpu.memory_space<smem>>
      %53 = arith.index_cast %52 : i32 to index
      %c0_20 = arith.constant 0 : index
      %54 = vector.load %arg2[%53, %c0_20] : memref<1024x128xf32, #tpu.memory_space<vmem>>, vector<1x128xf32>
      %55 = arith.index_cast %49 : i32 to index
      %c0_21 = arith.constant 0 : index
      %56 = vector.load %arg5[%55, %c0_21] : memref<256x128xf32, #tpu.memory_space<vmem>>, vector<1x128xf32>
      tpu.vector_store %arg5[%55, %c0_21], %54 {strides = array<i32>} : memref<256x128xf32, #tpu.memory_space<vmem>>, vector<1x128xf32>,
      %c6_i32 = arith.constant 6 : i32
      %57 = arith.addi %8, %c6_i32 : i32
      %58 = arith.addi %0, %57 : i32
      %59 = arith.index_cast %58 : i32 to index
      %60 = memref.load %arg1[%59] : memref<512xi32, #tpu.memory_space<smem>>
      %61 = arith.index_cast %60 : i32 to index
      %c0_22 = arith.constant 0 : index
      %62 = vector.load %arg2[%61, %c0_22] : memref<1024x128xf32, #tpu.memory_space<vmem>>, vector<1x128xf32>
      %63 = arith.index_cast %57 : i32 to index
      %c0_23 = arith.constant 0 : index
      %64 = vector.load %arg5[%63, %c0_23] : memref<256x128xf32, #tpu.memory_space<vmem>>, vector<1x128xf32>
      tpu.vector_store %arg5[%63, %c0_23], %62 {strides = array<i32>} : memref<256x128xf32, #tpu.memory_space<vmem>>, vector<1x128xf32>,
      %c7_i32 = arith.constant 7 : i32
      %65 = arith.addi %8, %c7_i32 : i32
      %66 = arith.addi %0, %65 : i32
      %67 = arith.index_cast %66 : i32 to index
      %68 = memref.load %arg1[%67] : memref<512xi32, #tpu.memory_space<smem>>
      %69 = arith.index_cast %68 : i32 to index
      %c0_24 = arith.constant 0 : index
      %70 = vector.load %arg2[%69, %c0_24] : memref<1024x128xf32, #tpu.memory_space<vmem>>, vector<1x128xf32>
      %71 = arith.index_cast %65 : i32 to index
      %c0_25 = arith.constant 0 : index
      %72 = vector.load %arg5[%71, %c0_25] : memref<256x128xf32, #tpu.memory_space<vmem>>, vector<1x128xf32>
      tpu.vector_store %arg5[%71, %c0_25], %70 {strides = array<i32>} : memref<256x128xf32, #tpu.memory_space<vmem>>, vector<1x128xf32>,
    }
    %c32_i32_0 = arith.constant 32 : i32
    %c0 = arith.constant 0 : index
    %c0_1 = arith.constant 0 : index
    %2 = vector.load %arg5[%c0, %c0_1] : memref<256x128xf32, #tpu.memory_space<vmem>>, vector<256x128xf32>
    %c0_2 = arith.constant 0 : index
    %c0_3 = arith.constant 0 : index
    %3 = vector.load %arg3[%c0_2, %c0_3] : memref<128x256xf32, #tpu.memory_space<vmem>>, vector<128x256xf32>
    %cst = arith.constant dense<0.000000e+00> : vector<256x256xf32>
    %4 = tpu.matmul %2, %3, %cst {dimension_numbers = #tpu.dot_dimension_numbers<[1], [0], [0], [1], [0, 0, 1, 1], [], []>} : vector<256x128xf32>, vector<128x256xf32>, vector<256x256xf32> -> vector<256x256xf32>
    %c0_4 = arith.constant 0 : index
    %c0_5 = arith.constant 0 : index
    %5 = vector.load %arg4[%c0_4, %c0_5] : memref<256x256xf32, #tpu.memory_space<vmem>>, vector<256x256xf32>
    tpu.vector_store %arg4[%c0_4, %c0_5], %4 {strides = array<i32>} : memref<256x256xf32, #tpu.memory_space<vmem>>, vector<256x256xf32>,
    return
  }
  func.func @transform_0(%arg0: i32, %arg1: memref<512xi32, #tpu.memory_space<smem>>) -> (i32, i32) {
    %c0_i32 = arith.constant 0 : i32
    %c0_i32_0 = arith.constant 0 : i32
    %c0_i32_1 = arith.constant 0 : i32
    return %c0_i32, %c0_i32_0 : i32, i32
  }
  func.func @transform_1(%arg0: i32, %arg1: memref<512xi32, #tpu.memory_space<smem>>) -> (i32, i32) {
    %c0_i32 = arith.constant 0 : i32
    %c0_i32_0 = arith.constant 0 : i32
    %c0_i32_1 = arith.constant 0 : i32
    return %c0_i32, %c0_i32_0 : i32, i32
  }
  func.func @transform_2(%arg0: i32, %arg1: memref<512xi32, #tpu.memory_space<smem>>) -> (i32, i32) {
    %c0_i32 = arith.constant 0 : i32
    %c0_i32_0 = arith.constant 0 : i32
    return %arg0, %c0_i32 : i32, i32
  }
}

</mosaic_0001>

<bundles_post_ra>
// kernel: tpu_custom_call.1
= control target key start
LH: loop header
LB: loop body
LE: loop exit
PB: predicated region body
PF: predicated region fallthrough
CT: control target
= control target key end

     0   :  { %s1380_s0 = inlined_call_operand.hbm [shape: s32[512], index: 0, kind: input, shape index: {}]   ;;  %s1381_s1 = inlined_call_operand.hbm [shape: f32[1024,128], index: 1, kind: input, shape index: {}]   ;;  %s1382_s2 = inlined_call_operand.hbm [shape: f32[128,256], index: 2, kind: input, shape index: {}]   ;;  %s1383_s3 = inlined_call_operand.hbm [shape: f32[512,256], index: 3, kind: output, shape index: {}]  }
   0x1   :  { %1389 = sst [smem:[#allocation17_spill]] %s1381_s1  ;;  %s885_s14 = scalar_lea.hbm %s1380_s0, 64 }
   0x2   :  { %1390 = sst [smem:[#allocation18_spill]] %s1382_s2  ;;  %p886_p0 = scmp.ne.s32.totalorder %s1380_s0, %s885_s14 }
   0x3   :  { %p889_p1 = scmp.lt.u32.totalorder %s885_s14, %s1380_s0 }
   0x5   :  { %p891_p2 = pnand %p889_p1, %p886_p0 }
   0x7   :  { %894 = shalt.err (!%p891_p2)  }
   0x8   :  { %s1033_s19 = smov [#allocation4]  }
   0x9   :  { %9 = dma.hbm_to_smem %s1380_s0, 64, %s1033_s19, [#allocation3] }
   0xa   :  { %999 = dma.done.wait [#allocation3], 64 }
   0xb   :  { %1000 = vsyncadd [#allocation3], 4294967232 }
   0xc   :  { %11 = sfence }
   0xd   :  { %12 = vsyncpa [#allocation6], 0 }
   0xe   :  { %13 = vsyncpa [#allocation9], 0 }
   0xf   :  { %14 = vsyncpa [#allocation7], 0 }
  0x10   :  { %16 = vsyncpa [#allocation7 + $0x1], 0  ;;  %s1076_s22 = smov 0   ;;  %s1078_s23 = smov 0  }
  0x11   :  { %s1080_s24 = smov 0   ;;  %s1082_s25 = smov 0  }
  0x12 LB: > { %1391 = sst [smem:[#allocation15_spill]] %s1023_s24  ;;  %s1097_s0 = sadd.s32 4294967295, %s1027_s25   ;;  %s1027_s25 = sphi %s1082_s25, %s1411_s25   ;;  %s1023_s24 = sphi %s1080_s24, %s1408_s24   ;;  %s1019_s23 = sphi %s1078_s23, %s1410_s23   ;;  %s1015_s22 = sphi %s1076_s22, %s1409_s22  }
  0x13   : > { %s729_s26 = sadd.s32 4294967294, %s1027_s25   ;;  %s1101_s27 = sadd.s32 1, %s1027_s25  }
  0x14   : > { %s71_s28 = sadd.s32 1, %s1023_s24  ;;  %s68_s29 = ssub.s32 %s1027_s25, %s1101_s27 }
  0x15   : > { %p81_p3 = scmp.ne.s32.totalorder %s1023_s24, %s1019_s23  ;;  %p69_p4 = scmp.eq.s32.totalorder %s68_s29, 0 }
  0x16   : > { %p82_p5 = scmp.eq.s32.totalorder %s1097_s0, 1  ;;  %p87_p6 = scmp.ne.s32.totalorder %s1019_s23, %s1015_s22 }
  0x17   : > { %p88_p7 = scmp.eq.s32.totalorder %s729_s26, 1  ;;  %p730_p10 = scmp.ge.s32.totalorder %s1027_s25, 1 }
  0x18   : > { %s1112_s30 = scalar_select %p69_p4, %s1023_s24, %s71_s28  }
  0x19   : > { %p1114_p8 = por %p82_p5, %p81_p3  ;;  %p1118_p9 = por %p88_p7, %p87_p6 }
  0x1a   : > { %1392 = sst [smem:[#allocation16_spill]] %s1112_s30  ;;  %p95_p11 = scmp.lt.s32.totalorder %s1027_s25, 3 }
  0x1b   : > { %s1393_s4 = scalar_select %p1114_p8, 1, 0 }
  0x1c   : > { %s1394_s5 = scalar_select %p1118_p9, 1, 0 }
  0x1d   : > { %p1384_p12 = scmp.eq.s32.totalorder %s1097_s0, 0  ;;  %p1125_p13 = pnand %p730_p10, %p95_p11 }
  0x1e   : > { %s1034_s7 = smov [#allocation5]   ;;  %s1035_s10 = smov [#allocation8]  }
  0x1f   : > { %s1395_s6 = scalar_select %p1125_p13, 1, 0 }
  0x20   : > { %s107_s8 = sshll.u32 %s1034_s7, 4  ;;  %p819_p0 = pneg %p1125_p13  ;;  %s108_s8 = int_to_ptr.vmem [resolvable:$true] %s107_s8 }
  0x21   : > { %s120_s11 = sshll.u32 %s1035_s10, 4  ;;  %s1397_s1 = sld [smem:[#allocation17_spill]]  ;;  %s1137_s11 = int_to_ptr.vmem [resolvable:$true] %s120_s11 }
  0x22   : > { %p1133_p1 = pnand %p1384_p12, %p819_p0 }
  0x24   : > { %p897_p3 = pneg %p1133_p1 }
  0x27   : > { %s895_s14 = scalar_lea.hbm %s1397_s1, 16384 }
  0x28   : > { %p896_p2 = scmp.ne.s32.totalorder %s1397_s1, %s895_s14  ;;  %p902_p6 = scmp.lt.u32.totalorder %s895_s14, %s1397_s1 }
  0x2a   : > { %p898_p4 = pnand %p897_p3, %p896_p2 }
  0x2c   : > { %p899_p5 = pneg %p898_p4 }
  0x2e   : > { %p904_p7 = pnand %p902_p6, %p899_p5 }
  0x30   : > { %907 = shalt.err (!%p904_p7)
}
  0x31   : > { %s908_s19 = scalar_lea.vmem %s108_s8, 16384  ;;  %p916_p12 = scmp.lt.s32.totalorder %s108_s8, %s108_s8 }
  0x32   : > { %p909_p10 = scmp.ne.s32.totalorder %s108_s8, %s908_s19  ;;  %p917_p9 = scmp.lt.s32.totalorder %s908_s19, %s908_s19 }
  0x34   : > { %p911_p11 = pnand %p909_p10, %p897_p3  ;;  %p918_p8 = por %p917_p9, %p916_p12 }
  0x36   : > { %p912_p0 = pneg %p911_p11 }
  0x38   : > { %p919_p13 = pnand %p918_p8, %p912_p0 }
  0x3a   : > { %922 = shalt.err (!%p919_p13)
}
  0x3b   : > { %s1036_s20 = smov 128   ;;  %s1037_s21 = smov 8  }
  0x3c   : > { %822 = dma.hbm_to_vmem [thread:$0]  (!%p1133_p1), %s1397_s1, 16384, %s108_s8, [#allocation6], %s1036_s20, %s1036_s20, %s1037_s21  }
  0x3d   : > { %s1398_s2 = sld [smem:[#allocation18_spill]] }
  0x43   : > { %s923_s10 = scalar_lea.hbm %s1398_s2, 4096 }
  0x44   : > { %p924_p2 = scmp.ne.s32.totalorder %s1398_s2, %s923_s10  ;;  %p930_p12 = scmp.lt.u32.totalorder %s923_s10, %s1398_s2 }
  0x46   : > { %p926_p8 = pnand %p924_p2, %p897_p3 }
  0x48   : > { %p927_p9 = pneg %p926_p8 }
  0x4a   : > { %p932_p13 = pnand %p930_p12, %p927_p9 }
  0x4c   : > { %935 = shalt.err (!%p932_p13)
}
  0x4d   : > { %s936_s8 = scalar_lea.vmem %s1137_s11, 4096  ;;  %p944_p7 = scmp.lt.s32.totalorder %s1137_s11, %s1137_s11 }
  0x4e   : > { %p937_p4 = scmp.ne.s32.totalorder %s1137_s11, %s936_s8  ;;  %p945_p10 = scmp.lt.s32.totalorder %s936_s8, %s936_s8 }
  0x50   : > { %p939_p5 = pnand %p937_p4, %p897_p3  ;;  %p946_p11 = por %p945_p10, %p944_p7 }
  0x52   : > { %p940_p6 = pneg %p939_p5 }
  0x54   : > { %p947_p0 = pnand %p946_p11, %p940_p6 }
  0x56   : > { %950 = shalt.err (!%p947_p0)
}
  0x57   : > { %s1038_s16 = smov 256   ;;  %s1039_s17 = smov 16  }
  0x58   : > { %825 = dma.hbm_to_vmem [thread:$0]  (!%p1133_p1), %s1398_s2, 4096, %s1137_s11, [#allocation9], %s1038_s16, %s1038_s16, %s1039_s17  }
  0x59   : > { %p1399_p2 = scmp.ne.s32.totalorder %s1395_s6, 0 }
  0x5a   : > { %p1400_p3 = scmp.eq.s32.totalorder (!%p1399_p2), %s1097_s0, 0 }
  0x5b   : > { %136 = sbr.rel (%p1399_p2) target bundleno = 444 (0x1bc), region = 28 }
  0x62   : > { %1002 = dma.done.wait (%p1400_p3), [#allocation6], 16384   ;;  %p1401_p8 = pmov %p1400_p3 }
  0x63   : > { %p1402_p9 = pmov %p1400_p3 }
  0x64   : > { %1004 = vsyncadd (%p1401_p8), [#allocation6], 4294950912 }
  0x65   : > { %1006 = dma.done.wait (%p1402_p9), [#allocation9], 4096   ;;  %p1403_p12 = pmov %p1400_p3 }
  0x66   : > { %s1387_s9 = sand.u32 1, %s1019_s23   ;;  %s1198_s11 = sshll.u32 %s1097_s0, 8 }
  0x67   : > { %1008 = vsyncadd (%p1403_p12), [#allocation9], 4294963200  ;;  %s736_s6 = sshll.u32 %s1387_s9, 9  ;;  %s1204_s21 = smov 0  }
  0x68   : > { %s1202_s20 = scalar_lea.vmem [#allocation10], %s736_s6 }
  0x69 LB: >> { %s1210_s26 = sshll.u32 %s1031_s21, 3  ;;  %s164_s21 = sadd.s32 1, %s1031_s21   ;;  %s1031_s21 = sphi %s1204_s21, %s164_s21  }
  0x6a   : >> { %s166_s28 = sadd.s32 %s1210_s26, %s1198_s11  ;;  %s172_s7 = sadd.s32 1, %s1210_s26 }
  0x6b   : >> { %s167_s29 = sld [smem:[#allocation4 + %s166_s28]]  ;;  %s173_s10 = sadd.s32 %s1198_s11, %s172_s7 }
  0x6c   : >> { %s179_s12 = sadd.s32 2, %s1210_s26  ;;  %s174_s13 = sld [smem:[#allocation4 + %s173_s10]] }
  0x6d   : >> { %s180_s14 = sadd.s32 %s1198_s11, %s179_s12  ;;  %s186_s8 = sadd.s32 3, %s1210_s26 }
  0x6e   : >> { %s181_s15 = sld [smem:[#allocation4 + %s180_s14]]  ;;  %s187_s16 = sadd.s32 %s1198_s11, %s186_s8 }
  0x6f   : >> { %s193_s17 = sadd.s32 4, %s1210_s26  ;;  %s188_s18 = sld [smem:[#allocation4 + %s187_s16]] }
  0x70   : >> { %s194_s19 = sadd.s32 %s1198_s11, %s193_s17  ;;  %s200_s28 = sadd.s32 5, %s1210_s26 }
  0x71   : >> { %s195_s6 = sld [smem:[#allocation4 + %s194_s19]]  ;;  %s168_s9 = scalar_lea.vmem [#allocation5], %s167_s29 }
  0x72   : >> { %v169_v0 = vld [vmem:[%s168_s9] sm:$0x1]  ;;  %s207_s1 = sadd.s32 6, %s1210_s26  ;;  %s170_s2 = scalar_lea.vmem [#allocation2], %s1210_s26 }
  0x73   : >> { %171 = vst [vmem:[%s170_s2] sm:$0x1] %v169_v0  ;;  %s201_s7 = sadd.s32 %s1198_s11, %s200_s28  ;;  %s175_s30 = scalar_lea.vmem [#allocation5], %s174_s13 }
  0x74   : >> { %v176_v1 = vld [vmem:[%s175_s30] sm:$0x1]  ;;  %s202_s10 = sld [smem:[#allocation4 + %s201_s7]]  ;;  %s182_s12 = scalar_lea.vmem [#allocation5], %s181_s15 }
  0x75   : >> { %740 = vst [vmem:[%s170_s2 + $0x1] sm:$0x1] %v176_v1  ;;  %v183_v2 = vld [vmem:[%s182_s12] sm:$0x1]  ;;  %s208_s14 = sadd.s32 %s1198_s11, %s207_s1  ;;  %s214_s8 = sadd.s32 7, %s1210_s26 }
  0x76   : >> { %742 = vst [vmem:[%s170_s2 + $0x2] sm:$0x1] %v183_v2  ;;  %s209_s16 = sld [smem:[#allocation4 + %s208_s14]]  ;;  %s189_s17 = scalar_lea.vmem [#allocation5], %s188_s18 }
  0x77   : >> { %v190_v3 = vld [vmem:[%s189_s17] sm:$0x1]  ;;  %s215_s29 = sadd.s32 %s1198_s11, %s214_s8  ;;  %s196_s9 = scalar_lea.vmem [#allocation5], %s195_s6 }
  0x78   : >> { %744 = vst [vmem:[%s170_s2 + $0x3] sm:$0x1] %v190_v3  ;;  %v197_v4 = vld [vmem:[%s196_s9] sm:$0x1]  ;;  %s216_s19 = sld [smem:[#allocation4 + %s215_s29]]  ;;  %p161_p1 = scmp.ge.s32.totalorder %s164_s21, 32  }
  0x79   : >> { %746 = vst [vmem:[%s170_s2 + $0x4] sm:$0x1] %v197_v4  ;;  %v254_v8 = vld [vmem:[#allocation8 + $0x8] sm:$0xff] (%p161_p1)  ;;  %v256_v9 = vld [vmem:[#allocation8 + $0x18] sm:$0xff] (%p161_p1)  ;;  %v253_v10 = vld [vmem:[#allocation8] sm:$0xff] (%p161_p1)  ;;  %v1040_v15 = vmov (%p161_p1), 0.0  }
  0x7a   : >> { %s203_s24 = scalar_lea.vmem [#allocation5], %s202_s10  ;;  %163 = sbr.rel (!%p161_p1) target bundleno = 105 (0x69), region = 92  ;;  %v761_v11 = vpack.c.bf16 (%p161_p1), %v256_v9, %v254_v8  ;;  %v255_v12 = vld [vmem:[#allocation8 + $0x10] sm:$0xff] (%p161_p1)  ;;  %v258_v13 = vld [vmem:[#allocation8 + $0x28] sm:$0xff] (%p161_p1)  ;;  %v260_v14 = vld [vmem:[#allocation8 + $0x38] sm:$0xff] (%p161_p1)  ;;  %349 = vmatprep.mubr.f32.mxu0 (%p161_p1), %v1040_v15  ;;  %445 = vmatprep.mubr.f32.mxu1 (%p161_p1), %v1040_v15 }
  0x7b   : >> { %v204_v5 = vld [vmem:[%s203_s24] sm:$0x1]  ;;  %v763_v16 = vpack.c.bf16 (%p161_p1), %v255_v12, %v253_v10  ;;  %v765_v17 = vpack.c.bf16 (%p161_p1), %v260_v14, %v258_v13  ;;  %v259_v19 = vld [vmem:[#allocation8 + $0x30] sm:$0xff] (%p161_p1)  ;;  %v262_v20 = vld [vmem:[#allocation8 + $0x48] sm:$0xff] (%p161_p1)  ;;  %s760_s1 = sshll.u32 (%p161_p1), %s1097_s0, 13  ;;  %s1404_s0 = sand.u32 (%p161_p1), 1, %s1019_s23  }
  0x7c   : >> { %748 = vst [vmem:[%s170_s2 + $0x5] sm:$0x1] %v204_v5  ;;  %s210_s30 = scalar_lea.vmem [#allocation5], %s209_s16  ;;  %v257_v18 = vld [vmem:[#allocation8 + $0x20] sm:$0xff] (%p161_p1)  ;;  %762 = vmatprep.subr.bf16.mxu0 (%p161_p1), %v761_v11  ;;  %793 = vmatprep.subr.bf16.mxu1 (%p161_p1), %v761_v11  ;;  %v264_v21 = vld [vmem:[#allocation8 + $0x58] sm:$0xff] (%p161_p1)  ;;  %v263_v25 = vld [vmem:[#allocation8 + $0x50] sm:$0xff] (%p161_p1)  ;;  %s1329_s21 = scalar_lea.hbm (%p161_p1), %s1383_s3, %s760_s1 }
  0x7d   : >> { %v211_v6 = vld [vmem:[%s210_s30] sm:$0x1]  ;;  %764 = vmatpush1.bf16.msra.mxu0 (%p161_p1), %v763_v16  ;;  %801 = vmatpush1.bf16.msra.mxu1 (%p161_p1), %v763_v16  ;;  %v767_v22 = vpack.c.bf16 (%p161_p1), %v259_v19, %v257_v18  ;;  %v769_v23 = vpack.c.bf16 (%p161_p1), %v264_v21, %v262_v20  ;;  %v266_v26 = vld [vmem:[#allocation8 + $0x68] sm:$0xff] (%p161_p1)  ;;  %v268_v27 = vld [vmem:[#allocation8 + $0x78] sm:$0xff] (%p161_p1)  ;;  %s1339_s26 = scalar_lea.sflag (%p161_p1), [#allocation7], %s1404_s0  ;;  %p1405_p4 = scmp.ne.s32.totalorder (%p161_p1), %s1393_s4, 0 }
  0x7e   : >> { %750 = vst [vmem:[%s170_s2 + $0x6] sm:$0x1] %v211_v6  ;;  %s217_s13 = scalar_lea.vmem [#allocation5], %s216_s19  ;;  %766 = vmatprep.subr.bf16.mxu0 (%p161_p1), %v765_v17  ;;  %794 = vmatprep.subr.bf16.mxu1 (%p161_p1), %v765_v17  ;;  %v261_v24 = vld [vmem:[#allocation8 + $0x40] sm:$0xff] (%p161_p1)  ;;  %v773_v29 = vpack.c.bf16 (%p161_p1), %v268_v27, %v266_v26  ;;  %v267_v31 = vld [vmem:[#allocation8 + $0x70] sm:$0xff] (%p161_p1)  ;;  %v270_v32 = vld [vmem:[#allocation8 + $0x88] sm:$0xff] (%p161_p1) }
  0x7f   : >> { %v218_v7 = vld [vmem:[%s217_s13] sm:$0x1]  ;;  %v771_v28 = vpack.c.bf16 (%p161_p1), %v263_v25, %v261_v24  ;;  %v272_v33 = vld [vmem:[#allocation8 + $0x98] sm:$0xff] (%p161_p1)  ;;  %v271_v37 = vld [vmem:[#allocation8 + $0x90] sm:$0xff] (%p161_p1)  ;;  %s1041_s18 = smov (%p161_p1), [#allocation10]  }
  0x80   : >> { %752 = vst [vmem:[%s170_s2 + $0x7] sm:$0x1] %v218_v7  ;;  %v265_v30 = vld [vmem:[#allocation8 + $0x60] sm:$0xff] (%p161_p1)  ;;  %v777_v35 = vpack.c.bf16 (%p161_p1), %v272_v33, %v270_v32  ;;  %v274_v38 = vld [vmem:[#allocation8 + $0xa8] sm:$0xff] (%p161_p1)  ;;  %v276_v39 = vld [vmem:[#allocation8 + $0xb8] sm:$0xff] (%p161_p1)  ;;  %s621_s2 = sshll.u32 (%p161_p1), %s1202_s20, 4  ;;  %s1331_s2 = int_to_ptr.vmem [resolvable:$true] %s621_s2 }
  0x81   : > { %768 = vmatpush1.bf16.msra.mxu0 %v767_v22  ;;  %802 = vmatpush1.bf16.msra.mxu1 %v767_v22  ;;  %v775_v34 = vpack.c.bf16 %v267_v31, %v265_v30  ;;  %v269_v36 = vld [vmem:[#allocation8 + $0x80] sm:$0xff]  ;;  %v781_v41 = vpack.c.bf16 %v276_v39, %v274_v38  ;;  %v275_v43 = vld [vmem:[#allocation8 + $0xb0] sm:$0xff]  ;;  %v278_v44 = vld [vmem:[#allocation8 + $0xc8] sm:$0xff]  ;;  %s951_s15 = scalar_lea.vmem %s1331_s2, 8192  ;;  %s955_s6 = sshll.u32 %s1041_s18, 4  ;;  %s956_s6 = int_to_ptr.vmem [resolvable:$false] %s955_s6 }
  0x82   : > { %770 = vmatprep.subr.bf16.mxu0 %v769_v23  ;;  %795 = vmatprep.subr.bf16.mxu1 %v769_v23  ;;  %v779_v40 = vpack.c.bf16 %v271_v37, %v269_v36  ;;  %v273_v42 = vld [vmem:[#allocation8 + $0xa0] sm:$0xff]  ;;  %v280_v45 = vld [vmem:[#allocation8 + $0xd8] sm:$0xff]  ;;  %v279_v49 = vld [vmem:[#allocation8 + $0xd0] sm:$0xff]  ;;  %p952_p13 = scmp.ne.s32.totalorder %s1331_s2, %s951_s15  ;;  %s957_s28 = scalar_lea.vmem %s956_s6, 16384 }
  0x83   : > { %v783_v46 = vpack.c.bf16 %v275_v43, %v273_v42  ;;  %v785_v47 = vpack.c.bf16 %v280_v45, %v278_v44  ;;  %v277_v48 = vld [vmem:[#allocation8 + $0xc0] sm:$0xff]  ;;  %v282_v50 = vld [vmem:[#allocation8 + $0xe8] sm:$0xff]  ;;  %v284_v51 = vld [vmem:[#allocation8 + $0xf8] sm:$0xff]  ;;  %p958_p7 = scmp.lt.s32.totalorder %s1331_s2, %s956_s6  ;;  %p959_p10 = scmp.lt.s32.totalorder %s957_s28, %s951_s15 }
  0x84   : > { %v787_v52 = vpack.c.bf16 %v279_v49, %v277_v48  ;;  %v789_v53 = vpack.c.bf16 %v284_v51, %v282_v50  ;;  %v281_v54 = vld [vmem:[#allocation8 + $0xe0] sm:$0xff]  ;;  %v283_v55 = vld [vmem:[#allocation8 + $0xf0] sm:$0xff]  ;;  %p953_p5 = pnand %p952_p13, %p1405_p4 }
  0x85   : > { %772 = vmatpush1.bf16.msra.mxu0 %v771_v28  ;;  %803 = vmatpush1.bf16.msra.mxu1 %v771_v28  ;;  %v791_v56 = vpack.c.bf16 %v283_v55, %v281_v54  ;;  %p960_p11 = por %p959_p10, %p958_p7 }
  0x86   : > { %774 = vmatprep.subr.bf16.mxu0 %v773_v29  ;;  %796 = vmatprep.subr.bf16.mxu1 %v773_v29  ;;  %p954_p6 = pneg %p953_p5 }
  0x87   : > { %v221_v57 = vld [vmem:[#allocation2] sm:$0xff]  ;;  %v222_v59 = vld [vmem:[#allocation2 + $0x8] sm:$0xff]  ;;  %v223_v61 = vld [vmem:[#allocation2 + $0x10] sm:$0xff] }
  0x88   : > { %v237_v58 = vld [vmem:[#allocation2 + $0x80] sm:$0xff]  ;;  %v238_v60 = vld [vmem:[#allocation2 + $0x88] sm:$0xff]  ;;  %v239_v62 = vld [vmem:[#allocation2 + $0x90] sm:$0xff]  ;;  %p961_p0 = pnand %p960_p11, %p954_p6 }
  0x89   : > { %776 = vmatpush1.bf16.msra.mxu0 %v775_v34  ;;  %804 = vmatpush1.bf16.msra.mxu1 %v775_v34  ;;  %v224_v63 = vld [vmem:[#allocation2 + $0x18] sm:$0xff]  ;;  %v225_v1 = vld [vmem:[#allocation2 + $0x20] sm:$0xff]  ;;  %v226_v3 = vld [vmem:[#allocation2 + $0x28] sm:$0xff] }
  0x8a   : > { %778 = vmatprep.subr.bf16.mxu0 %v777_v35  ;;  %797 = vmatprep.subr.bf16.mxu1 %v777_v35  ;;  %v240_v0 = vld [vmem:[#allocation2 + $0x98] sm:$0xff]  ;;  %v241_v2 = vld [vmem:[#allocation2 + $0xa0] sm:$0xff]  ;;  %v242_v4 = vld [vmem:[#allocation2 + $0xa8] sm:$0xff] }
  0x8b   : > { %v227_v5 = vld [vmem:[#allocation2 + $0x30] sm:$0xff]  ;;  %v228_v7 = vld [vmem:[#allocation2 + $0x38] sm:$0xff]  ;;  %v229_v9 = vld [vmem:[#allocation2 + $0x40] sm:$0xff] }
  0x8c   : > { %v243_v6 = vld [vmem:[#allocation2 + $0xb0] sm:$0xff]  ;;  %v244_v8 = vld [vmem:[#allocation2 + $0xb8] sm:$0xff]  ;;  %v245_v10 = vld [vmem:[#allocation2 + $0xc0] sm:$0xff] }
  0x8d   : > { %780 = vmatpush1.bf16.msra.mxu0 %v779_v40  ;;  %805 = vmatpush1.bf16.msra.mxu1 %v779_v40  ;;  %v230_v11 = vld [vmem:[#allocation2 + $0x48] sm:$0xff]  ;;  %v231_v13 = vld [vmem:[#allocation2 + $0x50] sm:$0xff]  ;;  %v232_v16 = vld [vmem:[#allocation2 + $0x58] sm:$0xff] }
  0x8e   : > { %782 = vmatprep.subr.bf16.mxu0 %v781_v41  ;;  %798 = vmatprep.subr.bf16.mxu1 %v781_v41  ;;  %v246_v12 = vld [vmem:[#allocation2 + $0xc8] sm:$0xff]  ;;  %v247_v14 = vld [vmem:[#allocation2 + $0xd0] sm:$0xff]  ;;  %v248_v17 = vld [vmem:[#allocation2 + $0xd8] sm:$0xff] }
  0x8f   : > { %v233_v18 = vld [vmem:[#allocation2 + $0x60] sm:$0xff]  ;;  %v234_v20 = vld [vmem:[#allocation2 + $0x68] sm:$0xff]  ;;  %v235_v22 = vld [vmem:[#allocation2 + $0x70] sm:$0xff] }
  0x90   : > { %v249_v19 = vld [vmem:[#allocation2 + $0xe0] sm:$0xff]  ;;  %v250_v21 = vld [vmem:[#allocation2 + $0xe8] sm:$0xff]  ;;  %v251_v23 = vld [vmem:[#allocation2 + $0xf0] sm:$0xff] }
  0x91   : > { %784 = vmatpush1.bf16.msra.mxu0 %v783_v46  ;;  %806 = vmatpush1.bf16.msra.mxu1 %v783_v46  ;;  %v236_v24 = vld [vmem:[#allocation2 + $0x78] sm:$0xff] }
  0x92   : > { %786 = vmatprep.subr.bf16.mxu0 %v785_v47  ;;  %799 = vmatprep.subr.bf16.mxu1 %v785_v47  ;;  %v252_v25 = vld [vmem:[#allocation2 + $0xf8] sm:$0xff] }
  0x95   : > { %788 = vmatpush1.bf16.msra.mxu0 %v787_v52  ;;  %807 = vmatpush1.bf16.msra.mxu1 %v787_v52 }
  0x96   : > { %790 = vmatprep.subr.bf16.mxu0 %v789_v53  ;;  %800 = vmatprep.subr.bf16.mxu1 %v789_v53 }
  0x99   : > { %792 = vmatpush1.bf16.msra.mxu0 %v791_v56  ;;  %808 = vmatpush1.bf16.msra.mxu1 %v791_v56 }
  0x9c   : > { %350 = vmatmul.mubr.f32.vlgmr.msra.gmra.mrb[0].mxu0 %v221_v57  ;;  %446 = vmatmul.mubr.f32.vlgmr.msra.gmra.mrb[0].mxu1 %v237_v58 }
  0x9d   : > { %355 = vmatprep.mubr.f32.mxu0 %v1040_v15  ;;  %451 = vmatprep.mubr.f32.mxu1 %v1040_v15 }
  0xa0   : > { %356 = vmatmul.mubr.f32.gmra.mrb[2].mxu0 %v222_v59  ;;  %452 = vmatmul.mubr.f32.gmra.mrb[2].mxu1 %v238_v60 }
  0xa1   : > { %361 = vmatprep.mubr.f32.mxu0 %v1040_v15  ;;  %457 = vmatprep.mubr.f32.mxu1 %v1040_v15 }
  0xa4   : > { %362 = vmatmul.mubr.f32.gmra.mrb[4].mxu0 %v223_v61  ;;  %458 = vmatmul.mubr.f32.gmra.mrb[4].mxu1 %v239_v62 }
  0xa5   : > { %367 = vmatprep.mubr.f32.mxu0 %v1040_v15  ;;  %463 = vmatprep.mubr.f32.mxu1 %v1040_v15 }
  0xa8   : > { %368 = vmatmul.mubr.f32.gmra.mrb[6].mxu0 %v224_v63  ;;  %464 = vmatmul.mubr.f32.gmra.mrb[6].mxu1 %v240_v0 }
  0xa9   : > { %373 = vmatprep.mubr.f32.mxu0 %v1040_v15  ;;  %469 = vmatprep.mubr.f32.mxu1 %v1040_v15 }
  0xac   : > { %374 = vmatmul.mubr.f32.gmra.mrb[8].mxu0 %v225_v1  ;;  %470 = vmatmul.mubr.f32.gmra.mrb[8].mxu1 %v241_v2 }
  0xad   : > { %379 = vmatprep.mubr.f32.mxu0 %v1040_v15  ;;  %475 = vmatprep.mubr.f32.mxu1 %v1040_v15 }
  0xb0   : > { %380 = vmatmul.mubr.f32.gmra.mrb[10].mxu0 %v226_v3  ;;  %476 = vmatmul.mubr.f32.gmra.mrb[10].mxu1 %v242_v4 }
  0xb1   : > { %385 = vmatprep.mubr.f32.mxu0 %v1040_v15  ;;  %481 = vmatprep.mubr.f32.mxu1 %v1040_v15 }
  0xb4   : > { %386 = vmatmul.mubr.f32.gmra.mrb[12].mxu0 %v227_v5  ;;  %482 = vmatmul.mubr.f32.gmra.mrb[12].mxu1 %v243_v6 }
  0xb5   : > { %391 = vmatprep.mubr.f32.mxu0 %v1040_v15  ;;  %487 = vmatprep.mubr.f32.mxu1 %v1040_v15 }
  0xb8   : > { %392 = vmatmul.mubr.f32.gmra.mrb[14].mxu0 %v228_v7  ;;  %488 = vmatmul.mubr.f32.gmra.mrb[14].mxu1 %v244_v8 }
  0xb9   : > { %397 = vmatprep.mubr.f32.mxu0 %v1040_v15  ;;  %493 = vmatprep.mubr.f32.mxu1 %v1040_v15 }
  0xbc   : > { %398 = vmatmul.mubr.f32.gmra.mrb[16].mxu0 %v229_v9  ;;  %494 = vmatmul.mubr.f32.gmra.mrb[16].mxu1 %v245_v10 }
  0xbd   : > { %403 = vmatprep.mubr.f32.mxu0 %v1040_v15  ;;  %499 = vmatprep.mubr.f32.mxu1 %v1040_v15 }
  0xc0   : > { %404 = vmatmul.mubr.f32.gmra.mrb[18].mxu0 %v230_v11  ;;  %500 = vmatmul.mubr.f32.gmra.mrb[18].mxu1 %v246_v12 }
  0xc1   : > { %409 = vmatprep.mubr.f32.mxu0 %v1040_v15  ;;  %505 = vmatprep.mubr.f32.mxu1 %v1040_v15 }
  0xc4   : > { %410 = vmatmul.mubr.f32.gmra.mrb[20].mxu0 %v231_v13  ;;  %506 = vmatmul.mubr.f32.gmra.mrb[20].mxu1 %v247_v14 }
  0xc5   : > { %415 = vmatprep.mubr.f32.mxu0 %v1040_v15  ;;  %511 = vmatprep.mubr.f32.mxu1 %v1040_v15 }
  0xc8   : > { %416 = vmatmul.mubr.f32.gmra.mrb[22].mxu0 %v232_v16  ;;  %512 = vmatmul.mubr.f32.gmra.mrb[22].mxu1 %v248_v17 }
  0xc9   : > { %421 = vmatprep.mubr.f32.mxu0 %v1040_v15  ;;  %517 = vmatprep.mubr.f32.mxu1 %v1040_v15 }
  0xcc   : > { %422 = vmatmul.mubr.f32.gmra.mrb[24].mxu0 %v233_v18  ;;  %518 = vmatmul.mubr.f32.gmra.mrb[24].mxu1 %v249_v19 }
  0xcd   : > { %427 = vmatprep.mubr.f32.mxu0 %v1040_v15  ;;  %523 = vmatprep.mubr.f32.mxu1 %v1040_v15 }
  0xd0   : > { %428 = vmatmul.mubr.f32.gmra.mrb[26].mxu0 %v234_v20  ;;  %524 = vmatmul.mubr.f32.gmra.mrb[26].mxu1 %v250_v21 }
  0xd1   : > { %433 = vmatprep.mubr.f32.mxu0 %v1040_v15  ;;  %529 = vmatprep.mubr.f32.mxu1 %v1040_v15 }
  0xd4   : > { %434 = vmatmul.mubr.f32.gmra.mrb[28].mxu0 %v235_v22  ;;  %530 = vmatmul.mubr.f32.gmra.mrb[28].mxu1 %v251_v23 }
  0xd5   : > { %439 = vmatprep.mubr.f32.mxu0 %v1040_v15  ;;  %535 = vmatprep.mubr.f32.mxu1 %v1040_v15 }
  0xd8   : > { %440 = vmatmul.mubr.f32.gmra.mrb[30].mxu0 %v236_v24  ;;  %536 = vmatmul.mubr.f32.gmra.mrb[30].mxu1 %v252_v25 }
 0x16f   : > { %v351_v26 = vpop.f32.mrb[0].mxu0  ;;  %v447_v27 = vpop.f32.mrb[0].mxu1 }
 0x170   : > { %542 = vst [vmem:[%s1202_s20] sm:$0xff] %v351_v26  ;;  %574 = vst [vmem:[%s1202_s20 + $0x100] sm:$0xff] %v447_v27  ;;  %v353_v28 = vpop.f32.mrb[1].mxu0  ;;  %v449_v29 = vpop.f32.mrb[1].mxu1 }
 0x171   : > { %543 = vst [vmem:[%s1202_s20 + $0x8] sm:$0xff] %v353_v28  ;;  %575 = vst [vmem:[%s1202_s20 + $0x108] sm:$0xff] %v449_v29 }
 0x173   : > { %v357_v15 = vpop.f32.mrb[2].mxu0  ;;  %v453_v30 = vpop.f32.mrb[2].mxu1 }
 0x174   : > { %544 = vst [vmem:[%s1202_s20 + $0x10] sm:$0xff] %v357_v15  ;;  %576 = vst [vmem:[%s1202_s20 + $0x110] sm:$0xff] %v453_v30  ;;  %v359_v31 = vpop.f32.mrb[3].mxu0  ;;  %v455_v32 = vpop.f32.mrb[3].mxu1 }
 0x175   : > { %545 = vst [vmem:[%s1202_s20 + $0x18] sm:$0xff] %v359_v31  ;;  %577 = vst [vmem:[%s1202_s20 + $0x118] sm:$0xff] %v455_v32 }
 0x177   : > { %v363_v33 = vpop.f32.mrb[4].mxu0  ;;  %v459_v34 = vpop.f32.mrb[4].mxu1 }
 0x178   : > { %546 = vst [vmem:[%s1202_s20 + $0x20] sm:$0xff] %v363_v33  ;;  %578 = vst [vmem:[%s1202_s20 + $0x120] sm:$0xff] %v459_v34  ;;  %v365_v35 = vpop.f32.mrb[5].mxu0  ;;  %v461_v36 = vpop.f32.mrb[5].mxu1 }
 0x179   : > { %547 = vst [vmem:[%s1202_s20 + $0x28] sm:$0xff] %v365_v35  ;;  %579 = vst [vmem:[%s1202_s20 + $0x128] sm:$0xff] %v461_v36 }
 0x17b   : > { %v369_v37 = vpop.f32.mrb[6].mxu0  ;;  %v465_v38 = vpop.f32.mrb[6].mxu1 }
 0x17c   : > { %548 = vst [vmem:[%s1202_s20 + $0x30] sm:$0xff] %v369_v37  ;;  %580 = vst [vmem:[%s1202_s20 + $0x130] sm:$0xff] %v465_v38  ;;  %v371_v39 = vpop.f32.mrb[7].mxu0  ;;  %v467_v40 = vpop.f32.mrb[7].mxu1 }
 0x17d   : > { %549 = vst [vmem:[%s1202_s20 + $0x38] sm:$0xff] %v371_v39  ;;  %581 = vst [vmem:[%s1202_s20 + $0x138] sm:$0xff] %v467_v40 }
 0x17f   : > { %v375_v41 = vpop.f32.mrb[8].mxu0  ;;  %v471_v42 = vpop.f32.mrb[8].mxu1 }
 0x180   : > { %550 = vst [vmem:[%s1202_s20 + $0x40] sm:$0xff] %v375_v41  ;;  %582 = vst [vmem:[%s1202_s20 + $0x140] sm:$0xff] %v471_v42  ;;  %v377_v43 = vpop.f32.mrb[9].mxu0  ;;  %v473_v44 = vpop.f32.mrb[9].mxu1 }
 0x181   : > { %551 = vst [vmem:[%s1202_s20 + $0x48] sm:$0xff] %v377_v43  ;;  %583 = vst [vmem:[%s1202_s20 + $0x148] sm:$0xff] %v473_v44 }
 0x183   : > { %v381_v45 = vpop.f32.mrb[10].mxu0  ;;  %v477_v46 = vpop.f32.mrb[10].mxu1 }
 0x184   : > { %552 = vst [vmem:[%s1202_s20 + $0x50] sm:$0xff] %v381_v45  ;;  %584 = vst [vmem:[%s1202_s20 + $0x150] sm:$0xff] %v477_v46  ;;  %v383_v47 = vpop.f32.mrb[11].mxu0  ;;  %v479_v48 = vpop.f32.mrb[11].mxu1 }
 0x185   : > { %553 = vst [vmem:[%s1202_s20 + $0x58] sm:$0xff] %v383_v47  ;;  %585 = vst [vmem:[%s1202_s20 + $0x158] sm:$0xff] %v479_v48 }
 0x187   : > { %v387_v49 = vpop.f32.mrb[12].mxu0  ;;  %v483_v50 = vpop.f32.mrb[12].mxu1 }
 0x188   : > { %554 = vst [vmem:[%s1202_s20 + $0x60] sm:$0xff] %v387_v49  ;;  %586 = vst [vmem:[%s1202_s20 + $0x160] sm:$0xff] %v483_v50  ;;  %v389_v51 = vpop.f32.mrb[13].mxu0  ;;  %v485_v52 = vpop.f32.mrb[13].mxu1 }
 0x189   : > { %555 = vst [vmem:[%s1202_s20 + $0x68] sm:$0xff] %v389_v51  ;;  %587 = vst [vmem:[%s1202_s20 + $0x168] sm:$0xff] %v485_v52 }
 0x18b   : > { %v393_v53 = vpop.f32.mrb[14].mxu0  ;;  %v489_v54 = vpop.f32.mrb[14].mxu1 }
 0x18c   : > { %556 = vst [vmem:[%s1202_s20 + $0x70] sm:$0xff] %v393_v53  ;;  %588 = vst [vmem:[%s1202_s20 + $0x170] sm:$0xff] %v489_v54  ;;  %v395_v55 = vpop.f32.mrb[15].mxu0  ;;  %v491_v56 = vpop.f32.mrb[15].mxu1 }
 0x18d   : > { %557 = vst [vmem:[%s1202_s20 + $0x78] sm:$0xff] %v395_v55  ;;  %589 = vst [vmem:[%s1202_s20 + $0x178] sm:$0xff] %v491_v56 }
 0x18f   : > { %v399_v57 = vpop.f32.mrb[16].mxu0  ;;  %v495_v58 = vpop.f32.mrb[16].mxu1 }
 0x190   : > { %558 = vst [vmem:[%s1202_s20 + $0x80] sm:$0xff] %v399_v57  ;;  %590 = vst [vmem:[%s1202_s20 + $0x180] sm:$0xff] %v495_v58  ;;  %v401_v59 = vpop.f32.mrb[17].mxu0  ;;  %v497_v60 = vpop.f32.mrb[17].mxu1 }
 0x191   : > { %559 = vst [vmem:[%s1202_s20 + $0x88] sm:$0xff] %v401_v59  ;;  %591 = vst [vmem:[%s1202_s20 + $0x188] sm:$0xff] %v497_v60 }
 0x193   : > { %v405_v61 = vpop.f32.mrb[18].mxu0  ;;  %v501_v62 = vpop.f32.mrb[18].mxu1 }
 0x194   : > { %560 = vst [vmem:[%s1202_s20 + $0x90] sm:$0xff] %v405_v61  ;;  %592 = vst [vmem:[%s1202_s20 + $0x190] sm:$0xff] %v501_v62  ;;  %v407_v63 = vpop.f32.mrb[19].mxu0  ;;  %v503_v0 = vpop.f32.mrb[19].mxu1 }
 0x195   : > { %561 = vst [vmem:[%s1202_s20 + $0x98] sm:$0xff] %v407_v63  ;;  %593 = vst [vmem:[%s1202_s20 + $0x198] sm:$0xff] %v503_v0 }
 0x197   : > { %v411_v1 = vpop.f32.mrb[20].mxu0  ;;  %v507_v2 = vpop.f32.mrb[20].mxu1 }
 0x198   : > { %562 = vst [vmem:[%s1202_s20 + $0xa0] sm:$0xff] %v411_v1  ;;  %594 = vst [vmem:[%s1202_s20 + $0x1a0] sm:$0xff] %v507_v2  ;;  %v413_v3 = vpop.f32.mrb[21].mxu0  ;;  %v509_v4 = vpop.f32.mrb[21].mxu1 }
 0x199   : > { %563 = vst [vmem:[%s1202_s20 + $0xa8] sm:$0xff] %v413_v3  ;;  %595 = vst [vmem:[%s1202_s20 + $0x1a8] sm:$0xff] %v509_v4 }
 0x19b   : > { %v417_v5 = vpop.f32.mrb[22].mxu0  ;;  %v513_v6 = vpop.f32.mrb[22].mxu1 }
 0x19c   : > { %564 = vst [vmem:[%s1202_s20 + $0xb0] sm:$0xff] %v417_v5  ;;  %596 = vst [vmem:[%s1202_s20 + $0x1b0] sm:$0xff] %v513_v6  ;;  %v419_v7 = vpop.f32.mrb[23].mxu0  ;;  %v515_v8 = vpop.f32.mrb[23].mxu1 }
 0x19d   : > { %565 = vst [vmem:[%s1202_s20 + $0xb8] sm:$0xff] %v419_v7  ;;  %597 = vst [vmem:[%s1202_s20 + $0x1b8] sm:$0xff] %v515_v8 }
 0x19f   : > { %v423_v9 = vpop.f32.mrb[24].mxu0  ;;  %v519_v10 = vpop.f32.mrb[24].mxu1 }
 0x1a0   : > { %566 = vst [vmem:[%s1202_s20 + $0xc0] sm:$0xff] %v423_v9  ;;  %598 = vst [vmem:[%s1202_s20 + $0x1c0] sm:$0xff] %v519_v10  ;;  %v425_v11 = vpop.f32.mrb[25].mxu0  ;;  %v521_v12 = vpop.f32.mrb[25].mxu1 }
 0x1a1   : > { %567 = vst [vmem:[%s1202_s20 + $0xc8] sm:$0xff] %v425_v11  ;;  %599 = vst [vmem:[%s1202_s20 + $0x1c8] sm:$0xff] %v521_v12 }
 0x1a3   : > { %v429_v13 = vpop.f32.mrb[26].mxu0  ;;  %v525_v14 = vpop.f32.mrb[26].mxu1 }
 0x1a4   : > { %568 = vst [vmem:[%s1202_s20 + $0xd0] sm:$0xff] %v429_v13  ;;  %600 = vst [vmem:[%s1202_s20 + $0x1d0] sm:$0xff] %v525_v14  ;;  %v431_v16 = vpop.f32.mrb[27].mxu0  ;;  %v527_v17 = vpop.f32.mrb[27].mxu1 }
 0x1a5   : > { %569 = vst [vmem:[%s1202_s20 + $0xd8] sm:$0xff] %v431_v16  ;;  %601 = vst [vmem:[%s1202_s20 + $0x1d8] sm:$0xff] %v527_v17 }
 0x1a7   : > { %v435_v18 = vpop.f32.mrb[28].mxu0  ;;  %v531_v19 = vpop.f32.mrb[28].mxu1 }
 0x1a8   : > { %570 = vst [vmem:[%s1202_s20 + $0xe0] sm:$0xff] %v435_v18  ;;  %602 = vst [vmem:[%s1202_s20 + $0x1e0] sm:$0xff] %v531_v19  ;;  %v437_v20 = vpop.f32.mrb[29].mxu0  ;;  %v533_v21 = vpop.f32.mrb[29].mxu1 }
 0x1a9   : > { %571 = vst [vmem:[%s1202_s20 + $0xe8] sm:$0xff] %v437_v20  ;;  %603 = vst [vmem:[%s1202_s20 + $0x1e8] sm:$0xff] %v533_v21 }
 0x1ab   : > { %v441_v22 = vpop.f32.mrb[30].mxu0  ;;  %v537_v23 = vpop.f32.mrb[30].mxu1 }
 0x1ac   : > { %572 = vst [vmem:[%s1202_s20 + $0xf0] sm:$0xff] %v441_v22  ;;  %604 = vst [vmem:[%s1202_s20 + $0x1f0] sm:$0xff] %v537_v23  ;;  %v443_v24 = vpop.f32.mrb[31].mxu0  ;;  %v539_v25 = vpop.f32.mrb[31].mxu1 }
 0x1ad   : > { %573 = vst [vmem:[%s1202_s20 + $0xf8] sm:$0xff] %v443_v24  ;;  %605 = vst [vmem:[%s1202_s20 + $0x1f8] sm:$0xff] %v539_v25 }
 0x1ae   : > { %964 = shalt.err (!%p961_p0)
}
 0x1af   : > { %s965_s20 = scalar_lea.hbm %s1329_s21, 8192  ;;  %s969_s12 = scalar_lea.hbm %s1383_s3, 16384 }
 0x1b0   : > { %p966_p2 = scmp.ne.s32.totalorder %s1329_s21, %s965_s20  ;;  %p970_p9 = scmp.lt.u32.totalorder %s1329_s21, %s1383_s3 }
 0x1b1   : > { %p971_p12 = scmp.lt.u32.totalorder %s969_s12, %s965_s20  ;;  %p973_p13 = scmp.lt.u32.totalorder %s965_s20, %s1329_s21 }
 0x1b2   : > { %p967_p3 = pnand %p966_p2, %p1405_p4 }
 0x1b3   : > { %p972_p1 = por %p971_p12, %p970_p9 }
 0x1b4   : > { %p968_p8 = pneg %p967_p3 }
 0x1b5   : > { %p974_p5 = por %p973_p13, %p972_p1 }
 0x1b7   : > { %p975_p6 = pnand %p974_p5, %p968_p8 }
 0x1b9   : > { %978 = shalt.err (!%p975_p6)
}
 0x1ba   : > { %s1042_s16 = smov 256   ;;  %s1043_s17 = smov 16  }
 0x1bb   : > { %817 = dma.vmem_to_hbm [thread:$0]  (%p1405_p4), %s1331_s2, 8192, %s1329_s21, %s1339_s26, %s1042_s16, %s1042_s16, %s1043_s17  }
 0x1bc PF: > { %p834_p7 = scmp.ge.s32.totalorder %s1027_s25, 2  ;;  %s636_s29 = sand.u32 1, %s1015_s22  }
 0x1bd   : > { %p1406_p10 = scmp.ne.s32.totalorder %s1394_s5, 0  ;;  %s637_s9 = scalar_lea.sflag [#allocation7], %s636_s29 }
 0x1bf   : > { %p827_p11 = pnand %p834_p7, %p1406_p10 }
 0x1c1   : > { %1010 = dma.done.wait (!%p827_p11), %s637_s9, 8192  }
 0x1c2   : > { %1012 = vsyncadd (!%p827_p11), %s637_s9, 4294959104  ;;  %s1407_s19 = sld [smem:[#allocation15_spill]]  ;;  %s1408_s24 = sld [smem:[#allocation16_spill]] }
 0x1c3   : > { %p19_p0 = scmp.ge.s32.totalorder %s1101_s27, 4   ;;  %s1409_s22 = smov %s1019_s23 }
 0x1c4   : > { %s1411_s25 = smov %s1101_s27 }
 0x1c5   :  { %21 = sbr.rel (!%p19_p0) target bundleno = 18 (0x12), region = 103 }
 0x1c8   : > { %s1410_s23 = smov %s1407_s19 }
 0x1cc   :  { %642 = vsyncpa [#allocation6], 1 }
 0x1cd   :  { %644 = vsyncpa [#allocation6 + $0x1], 1 }
 0x1ce   :  { %645 = vsyncpa [#allocation9], 1 }
 0x1cf   :  { %646 = vsyncpa [#allocation7], 1 }
 0x1d0   :  { %648 = vsyncpa [#allocation7 + $0x1], 1 }

</bundles_post_ra>
